<compile_context>
chip_gen: v7x
topology: tpu7x:2x2x1
jax: 0.10.0
libtpu: 0.0.40
codegen_flags: <defaults>
</compile_context>

<pallas_src>
import functools
import math

import jax
import jax.numpy as jnp
from jax import lax
from jax.experimental import pallas as pl
from jax.experimental.pallas import tpu as pltpu

_MASK_VALUE = -1e30   # large-negative instead of -inf: no inf-inf NaN risk


@functools.lru_cache(maxsize=None)
def _vmem_limit_bytes():
    """Generation-aware scoped-VMEM budget (~48 MiB on v7x, 64 MiB on v5e/v6e)."""
    try:
        cap = int(getattr(pltpu.get_tpu_info(), "vmem_capacity_bytes", 0))
        if cap > 0:
            return int(min(64 * 1024 * 1024, (cap * 3) // 4))
    except Exception:
        pass
    return 32 * 1024 * 1024


def _pick_tile(dim, target, align):
    """Largest divisor of `dim` that is <= target and a multiple of `align`;
    falls back to the full dim (full-extent blocks are always legal)."""
    # TODO(synk): pad awkward (non-divisible) dims up to a tile multiple instead of
    # falling back to a full-extent block for very large arrays.
    if dim <= target:
        return dim
    t = (target // align) * align
    while t >= align:
        if dim % t == 0:
            return t
        t -= align
    return dim


# ------------------------- tiled linear (matmul) kernel ------------------------

def _matmul_kernel(x_ref, w_ref, o_ref, acc_ref):
    @pl.when(pl.program_id(2) == 0)
    def _init():
        acc_ref[...] = jnp.zeros_like(acc_ref)

    acc_ref[...] += jnp.dot(x_ref[...], w_ref[...],
                            preferred_element_type=jnp.float32)

    @pl.when(pl.program_id(2) == pl.num_programs(2) - 1)
    def _store():
        o_ref[...] = acc_ref[...].astype(o_ref.dtype)


def linear(x, w, *, tm=512, tn=256, tk=None):
    """Tiled, pipelined x @ w with an f32 VMEM accumulator (bf16-aware tiles)."""
    M, K = x.shape
    K2, N = w.shape
    assert K == K2
    is_bf16 = x.dtype == jnp.bfloat16
    if tk is None:
        tk = 1024 if is_bf16 else 512
    sub = 16 if is_bf16 else 8
    tm = _pick_tile(M, tm, sub)
    tn = _pick_tile(N, tn, 128)
    tk = _pick_tile(K, tk, 128)
    grid = (M // tm, N // tn, K // tk)
    return pl.pallas_call(
        _matmul_kernel,
        out_shape=jax.ShapeDtypeStruct((M, N), x.dtype),
        grid_spec=pltpu.PrefetchScalarGridSpec(
            num_scalar_prefetch=0,
            grid=grid,
            in_specs=[
                pl.BlockSpec((tm, tk), lambda i, j, k: (i, k)),
                pl.BlockSpec((tk, tn), lambda i, j, k: (k, j)),
            ],
            out_specs=pl.BlockSpec((tm, tn), lambda i, j, k: (i, j)),
            scratch_shapes=[pltpu.VMEM((tm, tn), jnp.float32)],
        ),
        compiler_params=pltpu.CompilerParams(
            dimension_semantics=("parallel", "parallel", "arbitrary"),
            vmem_limit_bytes=_vmem_limit_bytes(),
        ),
    )(x, w)


# ----------------------------------- RoPE kernel --------------------------------

def _rope_kernel(x_ref, cos_ref, sin_ref, o_ref, *, half, ts):
    s_idx = pl.program_id(1)
    start = pl.multiple_of(s_idx * ts, ts)
    x = x_ref[0].astype(jnp.float32)              # RoPE math in f32 (v5e-safe)
    cos = cos_ref[pl.ds(start, ts), :]            # slice of the resident table
    sin = sin_ref[pl.ds(start, ts), :]
    d = x.shape[-1]
    if d % 128 == 0:
        # rotate_half via XLU roll; the sign is folded into the sin table.
        rot = pltpu.roll(x, shift=half, axis=-1)
    else:
        # head_dim smaller than a lane tile: fall back to slice + concat.
        rot = jnp.concatenate((x[:, half:], x[:, :half]), axis=-1)
    o_ref[0] = (x * cos + rot * sin).astype(o_ref.dtype)


def apply_rope(x, cos, sin_signed, *, ts=512):
    """x: (B*H, S, D); cos/sin_signed: (S, D) f32 (rotate_half sign folded into sin).
    The tables are given full-extent BlockSpecs (constant block index) so they are
    DMA'd into VMEM once and reused across the whole grid."""
    BH, S, D = x.shape
    ts = _pick_tile(S, ts, 16 if x.dtype == jnp.bfloat16 else 8)
    grid = (BH, S // ts)
    return pl.pallas_call(
        functools.partial(_rope_kernel, half=D // 2, ts=ts),
        out_shape=jax.ShapeDtypeStruct(x.shape, x.dtype),
        grid_spec=pltpu.PrefetchScalarGridSpec(
            num_scalar_prefetch=0,
            grid=grid,
            in_specs=[
                pl.BlockSpec((1, ts, D), lambda h, s: (h, s, 0)),
                pl.BlockSpec((S, D), lambda h, s: (0, 0)),   # resident cos table
                pl.BlockSpec((S, D), lambda h, s: (0, 0)),   # resident sin table
            ],
            out_specs=pl.BlockSpec((1, ts, D), lambda h, s: (h, s, 0)),
        ),
        compiler_params=pltpu.CompilerParams(
            dimension_semantics=("parallel", "parallel"),
            vmem_limit_bytes=_vmem_limit_bytes(),
        ),
    )(x, cos, sin_signed)


# --------------------------- flash attention kernel -----------------------------

def _flash_attn_kernel(q_ref, k_ref, v_ref, o_ref, m_sc, l_sc, acc_sc,
                       *, n_rep, tq, tk):
    qi = pl.program_id(1)
    ki = pl.program_id(2)
    q_start = qi * tq
    k_start = ki * tk
    q_last = q_start + (tq - 1)
    k_last = k_start + (tk - 1)

    @pl.when(ki == 0)
    def _init():
        m_sc[...] = jnp.full_like(m_sc, _MASK_VALUE)
        l_sc[...] = jnp.zeros_like(l_sc)
        acc_sc[...] = jnp.zeros_like(acc_sc)

    def accumulate(masked):
        k = k_ref[0]                                   # (tk, D)
        v = v_ref[0]                                   # (tk, D)
        if masked:
            # Local iota difference vs one scalar: global col > global row.
            diff = (lax.broadcasted_iota(jnp.int32, (tq, tk), 1)
                    - lax.broadcasted_iota(jnp.int32, (tq, tk), 0))
            causal_mask = diff > (q_start - k_start)
        # One K/V tile fetched from HBM services all n_rep grouped q heads (GQA reuse).
        for g in range(n_rep):
            q = q_ref[0, g]                            # (tq, D); 1/sqrt(D) pre-folded
            s = lax.dot_general(q, k, (((1,), (1,)), ((), ())),
                                preferred_element_type=jnp.float32)   # q @ k^T
            if masked:
                s = jnp.where(causal_mask, jnp.float32(_MASK_VALUE), s)
            m_prev = m_sc[g]
            m_new = jnp.maximum(m_prev, s.max(axis=-1, keepdims=True))
            alpha = jnp.exp(m_prev - m_new)
            p = jnp.exp(s - m_new)
            l_sc[g] = alpha * l_sc[g] + p.sum(axis=-1, keepdims=True)
            acc_sc[g] = alpha * acc_sc[g] + jnp.dot(
                p.astype(v.dtype), v, preferred_element_type=jnp.float32)
            m_sc[g] = m_new

    # Tiles entirely at or below the diagonal: no masking needed.
    @pl.when(k_last <= q_start)
    def _full_tile():
        accumulate(masked=False)

    # Diagonal-crossing tiles: apply the causal mask.  Tiles entirely above the
    # diagonal (k_start > q_last) are skipped altogether: no compute here, and the
    # clamped K/V index_map below means no DMA for them either.
    @pl.when(jnp.logical_and(k_start <= q_last, k_last > q_start))
    def _diag_tile():
        accumulate(masked=True)

    @pl.when(ki == pl.num_programs(2) - 1)
    def _finalize():
        # approx=True would route to the EUP; kept exact for the 1e-4 test tolerance.
        inv = pl.reciprocal(l_sc[...], approx=False)
        o_ref[0] = (acc_sc[...] * inv).astype(o_ref.dtype)


def flash_attention(q, k, v, *, tq=256, tk=256):
    """q: (B*Hkv, n_rep, S, D) grouped by kv head; k, v: (B*Hkv, S, D). Causal."""
    G, n_rep, S, D = q.shape
    assert k.shape == (G, S, D) and v.shape == (G, S, D)
    sub = 16 if q.dtype == jnp.bfloat16 else 8
    tq = _pick_tile(S, tq, sub)
    tk = _pick_tile(S, tk, sub)
    grid = (G, S // tq, S // tk)

    def q_map(g, qi, ki):
        return (g, 0, qi, 0)

    def kv_map(g, qi, ki):
        # Clamp to the last kv block the causal mask needs for this q tile: skipped
        # (above-diagonal) steps repeat the previous block index, so Pallas skips the
        # DMA instead of re-streaming K/V from HBM on no-op grid steps.
        last_needed = (qi * tq + tq - 1) // tk
        return (g, jnp.minimum(ki, last_needed), 0)

    return pl.pallas_call(
        functools.partial(_flash_attn_kernel, n_rep=n_rep, tq=tq, tk=tk),
        out_shape=jax.ShapeDtypeStruct((G, n_rep, S, D), q.dtype),
        grid_spec=pltpu.PrefetchScalarGridSpec(
            num_scalar_prefetch=0,
            grid=grid,
            in_specs=[
                pl.BlockSpec((1, n_rep, tq, D), q_map),
                pl.BlockSpec((1, tk, D), kv_map),
                pl.BlockSpec((1, tk, D), kv_map),
            ],
            out_specs=pl.BlockSpec((1, n_rep, tq, D), q_map),
            scratch_shapes=[
                pltpu.VMEM((n_rep, tq, 1), jnp.float32),   # running max
                pltpu.VMEM((n_rep, tq, 1), jnp.float32),   # running denominator
                pltpu.VMEM((n_rep, tq, D), jnp.float32),   # output accumulator
            ],
        ),
        compiler_params=pltpu.CompilerParams(
            # Leading (batch*kv-head, q-tile) axes are parallel (megacore sharding on
            # v7x streams different KV heads per TC); kv axis carries the accumulator.
            dimension_semantics=("parallel", "parallel", "arbitrary"),
            vmem_limit_bytes=_vmem_limit_bytes(),
        ),
    )(q, k, v)


# ------------------------------- module wrapper ---------------------------------

def rope_tables(head_dim, seqlen, rope_theta=10000.0):
    inv_freq = 1.0 / (
        rope_theta ** (jnp.arange(0, head_dim, 2, dtype=jnp.float32) / head_dim))
    t = jnp.arange(seqlen, dtype=jnp.float32)
    freqs = jnp.outer(t, inv_freq)                  # (S, D/2)
    freqs = jnp.concatenate((freqs, freqs), -1)     # (S, D)
    return jnp.cos(freqs), jnp.sin(freqs)


def prepare_params(params):
    """One-time parameter prep: fused QKV weight (hoisted out of the forward call)."""
    out = dict(params)
    out["w_qkv"] = jnp.concatenate([params["wq"], params["wk"], params["wv"]], axis=1)
    return out


def attention_forward(hidden_states, params, num_heads, num_kv_heads, head_dim,
                      rope_theta=10000.0):
    B, S, H = hidden_states.shape
    n_rep = num_heads // num_kv_heads
    Dq = num_heads * head_dim
    Dkv = num_kv_heads * head_dim
    x2d = hidden_states.reshape(B * S, H)

    # Fused QKV projection: one lane-dense tiled matmul instead of three.
    w_qkv = params.get("w_qkv")
    if w_qkv is None:   # fallback; normally fused once in prepare_params
        w_qkv = jnp.concatenate([params["wq"], params["wk"], params["wv"]], axis=1)
    qkv = linear(x2d, w_qkv)                                    # (B*S, Dq + 2*Dkv)
    q = qkv[:, :Dq].reshape(B, S, num_heads, head_dim)
    k = qkv[:, Dq:Dq + Dkv].reshape(B, S, num_kv_heads, head_dim)
    v = qkv[:, Dq + Dkv:].reshape(B, S, num_kv_heads, head_dim)

    # Head-major layout for RoPE / attention: (B*H, S, D).
    # TODO(synk): when head_dim % 128 == 0 these transposes can be folded into the
    # kernels' index_maps (read straight from the (B*S, Dq+2Dkv) buffer) to drop the
    # wrapper-level HBM copy passes; not applicable at head_dim=8.
    def to_bh(t, nh):
        return t.transpose(0, 2, 1, 3).reshape(B * nh, S, head_dim)
    q_bh, k_bh, v_bh = to_bh(q, num_heads), to_bh(k, num_kv_heads), to_bh(v, num_kv_heads)

    # RoPE applied once per q head and once per kv head (not n_rep times).
    # rotate_half sign folded into sin; 1/sqrt(head_dim) folded into q's tables.
    cos, sin = rope_tables(head_dim, S, rope_theta)
    half = head_dim // 2
    sin_signed = jnp.concatenate((-sin[:, :half], sin[:, half:]), axis=-1)
    scale = 1.0 / math.sqrt(head_dim)
    q_bh = apply_rope(q_bh, cos * scale, sin_signed * scale)
    k_bh = apply_rope(k_bh, cos, sin_signed)

    # GQA group-blocked layout (pure reshape, no data movement): q heads
    # j*n_rep .. (j+1)*n_rep-1 share kv head j, matching repeat_interleave semantics.
    q_grp = q_bh.reshape(B * num_kv_heads, n_rep, S, head_dim)

    # Flash attention with causal masking; each K/V tile reused across the group.
    o_grp = flash_attention(q_grp, k_bh, v_bh)       # (B*Hkv, n_rep, S, D)

    o = o_grp.reshape(B, num_kv_heads, n_rep, S, head_dim)
    o = o.transpose(0, 3, 1, 2, 4).reshape(B * S, Dq)
    return linear(o, params["wo"]).reshape(B, S, H)


# ----------------------------- pure-JAX reference --------------------------------

def attention_reference(hidden_states, params, num_heads, num_kv_heads, head_dim,
                        rope_theta=10000.0):
    B, S, H = hidden_states.shape
    n_rep = num_heads // num_kv_heads
    x2d = hidden_states.reshape(B * S, H)
    q = (x2d @ params["wq"]).reshape(B, S, num_heads, head_dim)
    k = (x2d @ params["wk"]).reshape(B, S, num_kv_heads, head_dim)
    v = (x2d @ params["wv"]).reshape(B, S, num_kv_heads, head_dim)

    cos, sin = rope_tables(head_dim, S, rope_theta)
    cos = cos[None, :, None, :]
    sin = sin[None, :, None, :]

    def rot(x):
        x1, x2 = jnp.split(x, 2, axis=-1)
        return jnp.concatenate((-x2, x1), axis=-1)

    q = q * cos + rot(q) * sin
    k = k * cos + rot(k) * sin
    k = jnp.repeat(k, n_rep, axis=2)
    v = jnp.repeat(v, n_rep, axis=2)

    q, k, v = (t.transpose(0, 2, 1, 3) for t in (q, k, v))
    s = jnp.einsum("bhqd,bhkd->bhqk", q, k) / math.sqrt(head_dim)
    mask = jnp.triu(jnp.full((S, S), -jnp.inf), k=1)
    s = s + mask[None, None]
    p = jax.nn.softmax(s.astype(jnp.float32), axis=-1).astype(q.dtype)
    o = jnp.einsum("bhqk,bhkd->bhqd", p, v)
    o = o.transpose(0, 2, 1, 3).reshape(B * S, num_heads * head_dim)
    return (o @ params["wo"]).reshape(B, S, H)


# --------------------------------------- main ------------------------------------

if __name__ == "__main__":
    B, S = 2, 8
    hidden_size = 32
    num_heads = 4
    num_kv_heads = 2
    head_dim = hidden_size // num_heads  # 8
    rope_theta = 10000.0
    # attention_bias = False; attention_dropout inactive (eval / p=0).
    # TODO(synk): kv-cache decode path (use_kv_cache / start_pos) not implemented; prefill-only.

    key = jax.random.PRNGKey(0)
    k_x, k_q, k_k, k_v, k_o = jax.random.split(key, 5)

    def init_linear(kk, fan_in, fan_out):
        bound = 1.0 / math.sqrt(fan_in)
        # stored as (in, out) so forward is x @ W
        return jax.random.uniform(kk, (fan_in, fan_out), jnp.float32,
                                  minval=-bound, maxval=bound)

    params = {
        "wq": init_linear(k_q, hidden_size, num_heads * head_dim),
        "wk": init_linear(k_k, hidden_size, num_kv_heads * head_dim),
        "wv": init_linear(k_v, hidden_size, num_kv_heads * head_dim),
        "wo": init_linear(k_o, num_heads * head_dim, hidden_size),
    }
    params = prepare_params(params)   # fused QKV weight built once, not per call

    hidden_states = jax.random.normal(k_x, (B, S, hidden_size), jnp.float32)

    out = attention_forward(hidden_states, params, num_heads, num_kv_heads,
                            head_dim, rope_theta)
    out = jax.block_until_ready(out)

    ref = attention_reference(hidden_states, params, num_heads, num_kv_heads,
                              head_dim, rope_theta)
    assert out.shape == (B, S, hidden_size)
    assert jnp.allclose(out, ref, atol=1e-4, rtol=1e-4), "mismatch vs reference"

    print("KERNEL_OK")
</pallas_src>

<mosaic_0001>
module attributes {stable_mosaic.version = 11 : i64} {
  func.func @_matmul_kernel(%arg0: i32, %arg1: i32, %arg2: i32, %arg3: memref<16x32xf32, #tpu.memory_space<vmem>>, %arg4: memref<32x64xf32, #tpu.memory_space<vmem>>, %arg5: memref<16x64xf32, #tpu.memory_space<vmem>>, %arg6: memref<16x64xf32, #tpu.memory_space<vmem>>) attributes {dimension_semantics = [#tpu.dimension_semantics<parallel>, #tpu.dimension_semantics<parallel>, #tpu.dimension_semantics<arbitrary>], iteration_bounds = array<i64: 1, 1, 1>, scalar_prefetch = 0 : i64, scratch_operands = 1 : i64, tpu.core_type = #tpu.core_type<tc>, window_params = [{transform_indices = @transform_0, window_bounds = array<i64: 16, 32>}, {transform_indices = @transform_1, window_bounds = array<i64: 32, 64>}, {transform_indices = @transform_2, window_bounds = array<i64: 16, 64>}]} {
    %c0_i32 = arith.constant 0 : i32
    %0 = arith.cmpi eq, %arg2, %c0_i32 : i32
    %1 = arith.extui %0 : i1 to i32
    %c0_i32_0 = arith.constant 0 : i32
    %2 = arith.cmpi ne, %1, %c0_i32_0 : i32
    scf.if %2 {
      %cst_10 = arith.constant 0.000000e+00 : f32
      %12 = vector.broadcast %cst_10 : f32 to vector<16x64xf32>
      %c0_11 = arith.constant 0 : index
      %c0_12 = arith.constant 0 : index
      %13 = vector.load %arg6[%c0_11, %c0_12] : memref<16x64xf32, #tpu.memory_space<vmem>>, vector<16x64xf32>
      tpu.vector_store %arg6[%c0_11, %c0_12], %12 {strides = array<i32>} : memref<16x64xf32, #tpu.memory_space<vmem>>, vector<16x64xf32>,
    } else {
    }
    %c0 = arith.constant 0 : index
    %c0_1 = arith.constant 0 : index
    %3 = vector.load %arg6[%c0, %c0_1] : memref<16x64xf32, #tpu.memory_space<vmem>>, vector<16x64xf32>
    %c0_2 = arith.constant 0 : index
    %c0_3 = arith.constant 0 : index
    %4 = vector.load %arg3[%c0_2, %c0_3] : memref<16x32xf32, #tpu.memory_space<vmem>>, vector<16x32xf32>
    %c0_4 = arith.constant 0 : index
    %c0_5 = arith.constant 0 : index
    %5 = vector.load %arg4[%c0_4, %c0_5] : memref<32x64xf32, #tpu.memory_space<vmem>>, vector<32x64xf32>
    %cst = arith.constant dense<0.000000e+00> : vector<16x64xf32>
    %6 = tpu.matmul %4, %5, %cst {dimension_numbers = #tpu.dot_dimension_numbers<[1], [0], [0], [1], [0, 0, 1, 1], [], []>} : vector<16x32xf32>, vector<32x64xf32>, vector<16x64xf32> -> vector<16x64xf32>
    %7 = arith.addf %3, %6 : vector<16x64xf32>
    %c0_6 = arith.constant 0 : index
    %c0_7 = arith.constant 0 : index
    %8 = vector.load %arg6[%c0_6, %c0_7] : memref<16x64xf32, #tpu.memory_space<vmem>>, vector<16x64xf32>
    tpu.vector_store %arg6[%c0_6, %c0_7], %7 {strides = array<i32>} : memref<16x64xf32, #tpu.memory_space<vmem>>, vector<16x64xf32>,
    %c0_i32_8 = arith.constant 0 : i32
    %9 = arith.cmpi eq, %arg2, %c0_i32_8 : i32
    %10 = arith.extui %9 : i1 to i32
    %c0_i32_9 = arith.constant 0 : i32
    %11 = arith.cmpi ne, %10, %c0_i32_9 : i32
    scf.if %11 {
      %c0_10 = arith.constant 0 : index
      %c0_11 = arith.constant 0 : index
      %12 = vector.load %arg6[%c0_10, %c0_11] : memref<16x64xf32, #tpu.memory_space<vmem>>, vector<16x64xf32>
      %c0_12 = arith.constant 0 : index
      %c0_13 = arith.constant 0 : index
      %13 = vector.load %arg5[%c0_12, %c0_13] : memref<16x64xf32, #tpu.memory_space<vmem>>, vector<16x64xf32>
      tpu.vector_store %arg5[%c0_12, %c0_13], %12 {strides = array<i32>} : memref<16x64xf32, #tpu.memory_space<vmem>>, vector<16x64xf32>,
    } else {
    }
    return
  }
  func.func @transform_0(%arg0: i32, %arg1: i32, %arg2: i32) -> (i32, i32) {
    %c0_i32 = arith.constant 0 : i32
    return %arg0, %arg2 : i32, i32
  }
  func.func @transform_1(%arg0: i32, %arg1: i32, %arg2: i32) -> (i32, i32) {
    %c0_i32 = arith.constant 0 : i32
    return %arg2, %arg1 : i32, i32
  }
  func.func @transform_2(%arg0: i32, %arg1: i32, %arg2: i32) -> (i32, i32) {
    %c0_i32 = arith.constant 0 : i32
    return %arg0, %arg1 : i32, i32
  }
}

</mosaic_0001>

<bundles_post_ra>
// kernel: tpu_custom_call.1
= control target key start
LH: loop header
LB: loop body
LE: loop exit
PB: predicated region body
PF: predicated region fallthrough
CT: control target
= control target key end

     0   :  { %7 = vsyncpa [#allocation4], 0  ;;  %s344_s0 = inlined_call_operand.hbm [shape: f32[16,32], index: 0, kind: input, shape index: {}]   ;;  %s345_s1 = inlined_call_operand.hbm [shape: f32[32,64], index: 1, kind: input, shape index: {}]   ;;  %s346_s2 = inlined_call_operand.hbm [shape: f32[16,64], index: 2, kind: output, shape index: {}]  }
   0x1   :  { %8 = vsyncpa [#allocation7], 0 }
   0x2   :  { %9 = vsyncpa [#allocation5], 0  ;;  %s272_s9 = smov [#allocation3]   ;;  %s200_s13 = scalar_lea.hbm %s344_s0, 256 }
   0x3   :  { %s15_s10 = sshll.u32 %s272_s9, 4  ;;  %p201_p0 = scmp.ne.s32.totalorder %s344_s0, %s200_s13  ;;  %s16_s10 = int_to_ptr.vmem [resolvable:$true] %s15_s10 }
   0x4   :  { %p204_p1 = scmp.lt.u32.totalorder %s200_s13, %s344_s0 }
   0x6   :  { %p206_p2 = pnand %p204_p1, %p201_p0 }
   0x8   :  { %209 = shalt.err (!%p206_p2)
}
   0x9   :  { %s210_s18 = scalar_lea.vmem %s16_s10, 256  ;;  %p215_p4 = scmp.lt.s32.totalorder %s16_s10, %s16_s10 }
   0xa   :  { %p211_p3 = scmp.ne.s32.totalorder %s16_s10, %s210_s18  ;;  %p216_p5 = scmp.lt.s32.totalorder %s210_s18, %s210_s18 }
   0xc   :  { %p217_p6 = por %p216_p5, %p215_p4 }
   0xe   :  { %p218_p7 = pnand %p217_p6, %p211_p3 }
  0x10   :  { %221 = shalt.err (!%p218_p7)
}
  0x11   :  { %s273_s19 = smov 128   ;;  %s274_s20 = smov 8  }
  0x12   :  { %21 = dma.hbm_to_vmem [thread:$0]  %s344_s0, 256, %s16_s10, [#allocation4], %s273_s19, %s273_s19, %s274_s20  }
  0x13   :  { %s275_s23 = smov [#allocation6]   ;;  %s222_s27 = scalar_lea.hbm %s345_s1, 512 }
  0x14   :  { %s27_s24 = sshll.u32 %s275_s23, 4  ;;  %p223_p8 = scmp.ne.s32.totalorder %s345_s1, %s222_s27  ;;  %s28_s24 = int_to_ptr.vmem [resolvable:$true] %s27_s24 }
  0x15   :  { %p226_p9 = scmp.lt.u32.totalorder %s222_s27, %s345_s1 }
  0x17   :  { %p228_p10 = pnand %p226_p9, %p223_p8 }
  0x19   :  { %231 = shalt.err (!%p228_p10)
}
  0x1a   :  { %s232_s4 = scalar_lea.vmem %s28_s24, 512  ;;  %p237_p12 = scmp.lt.s32.totalorder %s28_s24, %s28_s24 }
  0x1b   :  { %p233_p11 = scmp.ne.s32.totalorder %s28_s24, %s232_s4  ;;  %p238_p13 = scmp.lt.s32.totalorder %s232_s4, %s232_s4 }
  0x1d   :  { %p239_p0 = por %p238_p13, %p237_p12 }
  0x1f   :  { %p240_p1 = pnand %p239_p0, %p233_p11 }
  0x21   :  { %243 = shalt.err (!%p240_p1)
}
  0x22   :  { %33 = dma.hbm_to_vmem [thread:$0]  %s345_s1, 512, %s28_s24, [#allocation7], %s273_s19, %s273_s19, %s274_s20  }
  0x23   :  { %266 = dma.done.wait [#allocation4], 256  }
  0x24   :  { %267 = vsyncadd [#allocation4], 4294967040 }
  0x25   :  { %268 = dma.done.wait [#allocation7], 512  }
  0x26   :  { %269 = vsyncadd [#allocation7], 4294966784  ;;  %vm44_vm0 = vcmask 523264   ;;  %v276_v0 = vmov 0.0   ;;  %vm55_vm1 = vcmask 261120   ;;  %v51_v1 = vld [vmem:[#allocation6] sm:$0xff] }
  0x27   :  { %46 = vst.msk [vmem:[#allocation2 + $0x8] sm:$0xff] %vm44_vm0, %v276_v0  ;;  %45 = vst.msk [vmem:[#allocation2] sm:$0xff] %vm44_vm0, %v276_v0  ;;  %v52_v2 = vld [vmem:[#allocation6 + $0x8] sm:$0xff]  ;;  %v53_v3 = vld [vmem:[#allocation6 + $0x10] sm:$0xff]  ;;  %s277_s1 = smov [#allocation8]  }
  0x28   :  { %v186_v4 = vpack.c.bf16 %v52_v2, %v51_v1  ;;  %v54_v5 = vld [vmem:[#allocation6 + $0x18] sm:$0xff]  ;;  %v49_v6 = vld [vmem:[#allocation3] sm:$0xff]  ;;  %s154_s6 = sshll.u32 %s277_s1, 4  ;;  %s155_s6 = int_to_ptr.vmem [resolvable:$true] %s154_s6 }
  0x29   :  { %v190_v7 = vpack.c.bf16 %v54_v5, %v53_v3  ;;  %183 = vmatprep.mubr.msk.f32.mxu0 %vm55_vm1, %v49_v6  ;;  %v50_v8 = vld [vmem:[#allocation3 + $0x8] sm:$0xff]  ;;  %s244_s7 = scalar_lea.vmem %s155_s6, 256  ;;  %p249_p3 = scmp.lt.s32.totalorder %s155_s6, %s155_s6 }
  0x2a   :  { %187 = vmatprep.subr.bf16.mxu0 %v186_v4  ;;  %p245_p2 = scmp.ne.s32.totalorder %s155_s6, %s244_s7  ;;  %p250_p4 = scmp.lt.s32.totalorder %s244_s7, %s244_s7 }
  0x2b   :  { %189 = vmatpush3.bf16.msra.mxu0 %v186_v4 }
  0x2c   :  { %191 = vmatprep.subr.bf16.mxu0 %v190_v7  ;;  %p251_p5 = por %p250_p4, %p249_p3 }
  0x2e   :  { %v48_v9 = vld [vmem:[#allocation2 + $0x8] sm:$0xff]  ;;  %v47_v10 = vld [vmem:[#allocation2] sm:$0xff]  ;;  %p252_p6 = pnand %p251_p5, %p245_p2 }
  0x2f   :  { %193 = vmatpush3.bf16.msra.mxu0 %v190_v7 }
  0x32   :  { %184 = vmatmul.mubr.msk.f32.vlgmr.msra.gmra.mrb[0].mxu0 %vm55_vm1, %v50_v8 }
 0x105   :  { %v185_v11 = vpop.f32.mrb[0].mxu0 }
 0x106   :  { %v138_v12 = vadd.f32 %v185_v11, %v48_v9  ;;  %v128_v13 = vpop.f32.mrb[1].mxu0 }
 0x107   :  { %v137_v14 = vadd.f32 %v128_v13, %v47_v10 }
 0x108   :  { %141 = vst.msk [vmem:[#allocation2 + $0x8] sm:$0xff] %vm44_vm0, %v138_v12 }
 0x109   :  { %140 = vst.msk [vmem:[#allocation2] sm:$0xff] %vm44_vm0, %v137_v14 }
 0x10f   :  { %v146_v15 = vld [vmem:[#allocation2 + $0x8] sm:$0xff] }
 0x110   :  { %v145_v16 = vld [vmem:[#allocation2] sm:$0xff]  ;;  %148 = vst.msk [vmem:[#allocation8 + $0x8] sm:$0xff] %vm44_vm0, %v146_v15 }
 0x111   :  { %147 = vst.msk [vmem:[#allocation8] sm:$0xff] %vm44_vm0, %v145_v16 }
 0x112   :  { %255 = shalt.err (!%p252_p6)
}
 0x113   :  { %s256_s10 = scalar_lea.hbm %s346_s2, 256 }
 0x114   :  { %p257_p7 = scmp.ne.s32.totalorder %s346_s2, %s256_s10  ;;  %p260_p8 = scmp.lt.u32.totalorder %s256_s10, %s346_s2 }
 0x116   :  { %p262_p9 = pnand %p260_p8, %p257_p7 }
 0x118   :  { %265 = shalt.err (!%p262_p9)
}
 0x119   :  { %160 = dma.vmem_to_hbm [thread:$0]  %s155_s6, 256, %s346_s2, [#allocation5], %s273_s19, %s273_s19, %s274_s20  }
 0x11a   :  { %270 = dma.done.wait [#allocation5], 256  }
 0x11b   :  { %271 = vsyncadd [#allocation5], 4294967040 }
 0x11c   :  { %164 = vsyncpa [#allocation4], 1 }
 0x11d   :  { %165 = vsyncpa [#allocation7], 1 }
 0x11e   :  { %166 = vsyncpa [#allocation5], 1 }

</bundles_post_ra>
